<compile_context>
chip_gen: v5e
topology: v5e:2x2
jax: 0.10.0
libtpu: 0.0.40
codegen_flags: <defaults>
</compile_context>

<pallas_src>
import functools

import jax
import jax.numpy as jnp
from jax import lax
from jax.experimental import pallas as pl
from jax.experimental.pallas import tpu as pltpu


# ----------------------------------------------------------------------------
# In-kernel helper: 'same' 3x3 conv (stride 1) + folded-norm affine in the
# flattened NC(H*W) layout.  `x` is a (C, H*W) f32 value; returns (Cout, H*W)
# f32.  xpad_ref / col_ref are VMEM scratch buffers.
# ----------------------------------------------------------------------------
def _conv3x3_affine(x, w_ref, scale_ref, bias_ref, wmask_ref,
                    xpad_ref, col_ref, *, H, W, p, d, KH, KW, off):
    C, HW = x.shape
    # Zero-filled padded copy of the image rows (handles the H halo).  `off`
    # is 128-aligned so the interior store is a lane-dense, unmasked store.
    xpad_ref[...] = jnp.zeros(xpad_ref.shape, xpad_ref.dtype)
    xpad_ref[:, off:off + HW] = x

    # im2col: stage all 9 taps into one (KH*KW*C, H*W) bf16 patch buffer.
    for kh in range(KH):
        for kw in range(KW):
            t = kh * KW + kw
            base = off - p * W - p + (kh * d) * W + kw * d
            tap = xpad_ref[:, base:base + HW]
            lo, hi = p - kw * d, W + p - kw * d
            if lo > 0 or hi < W:                 # W halo: zero wrapped columns
                tap = tap * wmask_ref[kw:kw + 1, :]
            col_ref[t * C:(t + 1) * C, :] = tap.astype(col_ref.dtype)

    # Single MXU matmul over the full K = KH*KW*Cin contraction (bf16 -> f32).
    acc = jnp.dot(w_ref[...], col_ref[...], preferred_element_type=jnp.float32)
    return acc * scale_ref[...] + bias_ref[...]


def _conv_bn_kernel(x_ref, w_ref, scale_ref, bias_ref, wmask_ref, o_ref,
                    xpad_ref, col_ref, *, H, W, p, d, KH, KW, off):
    y = _conv3x3_affine(x_ref[0].astype(jnp.float32), w_ref, scale_ref,
                        bias_ref, wmask_ref, xpad_ref, col_ref,
                        H=H, W=W, p=p, d=d, KH=KH, KW=KW, off=off)
    o_ref[0] = y.astype(o_ref.dtype)


def _fused_mid_kernel(x_ref, k2_ref, w_ref, scale_ref, bias_ref, wmask_ref,
                      o_ref, xpad_ref, col_ref, *, H, W, p, d, KH, KW, off):
    # Fused prologue: out = sigmoid(identity + resized k2 output).
    out = jax.nn.sigmoid(x_ref[0].astype(jnp.float32)
                         + k2_ref[0].astype(jnp.float32))
    temp = _conv3x3_affine(out, w_ref, scale_ref, bias_ref, wmask_ref,
                           xpad_ref, col_ref,
                           H=H, W=W, p=p, d=d, KH=KH, KW=KW, off=off)
    # Fused epilogue: temp * out  (`out` re-read from the padded scratch so it
    # does not have to stay live in vregs across the matmul).
    o_ref[0] = (temp * xpad_ref[:, off:off + H * W]).astype(o_ref.dtype)


# ----------------------------------------------------------------------------
# pallas_call wrapper shared by all three conv stages.
# ----------------------------------------------------------------------------
def _conv_call(kernel_body, act_inputs, w_bf16, scale, bias, *,
               H, W, p, d, out_dtype):
    N, C, HW = act_inputs[0].shape
    Cout, KKC = w_bf16.shape
    KH = KW = 3
    assert KKC == KH * KW * C

    # 128-aligned placement of the image interior inside the padded scratch.
    off = max(128, -(-(p * W + p) // 128) * 128)
    lpad = off + HW + p * W + p                  # covers the largest tap window

    # Per-tap W-boundary masks, built once host-side (tiny constant).
    wpos = jnp.tile(jnp.arange(W, dtype=jnp.int32), H)[None, :]          # (1,HW)
    kw_i = jnp.arange(KW, dtype=jnp.int32)[:, None]                      # (KW,1)
    lo = p - kw_i * d
    wmask = ((wpos >= lo) & (wpos < W + lo)).astype(jnp.float32)         # (KW,HW)

    act_spec = pl.BlockSpec((1, C, HW), lambda n: (n, 0, 0))
    in_specs = ([act_spec] * len(act_inputs) + [
        pl.BlockSpec((Cout, KKC), lambda n: (0, 0)),
        pl.BlockSpec((Cout, 1), lambda n: (0, 0)),
        pl.BlockSpec((Cout, 1), lambda n: (0, 0)),
        pl.BlockSpec((KW, HW), lambda n: (0, 0)),
    ])
    scratch = [pltpu.VMEM((C, lpad), jnp.float32),           # zero-padded image
               pltpu.VMEM((KH * KW * C, HW), jnp.bfloat16)]  # im2col buffer

    # Explicit VMEM budget (keeps v7x's 64 MiB physical VMEM respected).
    need = (2 * (len(act_inputs) * C * HW * 4 + Cout * HW * 4)
            + Cout * KKC * 2 + 2 * Cout * 4 + KW * HW * 4
            + C * lpad * 4 + KH * KW * C * HW * 2)
    vmem_limit = int(min(max(4 << 20, 2 * need), 48 << 20))

    kernel = functools.partial(kernel_body, H=H, W=W, p=p, d=d,
                               KH=KH, KW=KW, off=off)
    return pl.pallas_call(
        kernel,
        out_shape=jax.ShapeDtypeStruct((N, Cout, HW), out_dtype),
        grid=(N,),
        in_specs=in_specs,
        out_specs=pl.BlockSpec((1, Cout, HW), lambda n: (n, 0, 0)),
        scratch_shapes=scratch,
        compiler_params=pltpu.CompilerParams(
            dimension_semantics=("parallel",),
            vmem_limit_bytes=vmem_limit),
    )(*act_inputs, w_bf16, scale, bias, wmask)


# ----------------------------------------------------------------------------
# Module
# ----------------------------------------------------------------------------
class Conv3ePallas:
    """Pallas-TPU Conv3_e.  Norm layers are folded per-channel affine
    (eval-mode BatchNorm).
    TODO(synk): InstanceNorm2d (per-sample statistics) and groups > 1 are not
    implemented in the kernel."""

    def __init__(self, inplanes, planes, stride, padding, dilation, groups,
                 pooling_r, key, eps=1e-5):
        assert inplanes == planes, "Conv3_e forward requires inplanes == planes"
        assert groups == 1          # TODO(synk): grouped conv not implemented
        # Kernel is specialized to 'same' 3x3 convs, which is how Conv3_e is
        # always constructed (padding == dilation).
        assert padding == dilation, "kernel specialized to 'same' 3x3 convs"
        del pooling_r               # unused in forward (matches reference)

        self.stride = stride
        self.padding = padding
        self.dilation = dilation
        self.planes = planes

        keys = jax.random.split(key, 15)    # distinct keys per branch (no reuse)
        fan_in = inplanes * 9

        def make_branch(kw_, kg, kb, km, kv):
            w_oihw = jax.random.normal(kw_, (planes, inplanes, 3, 3),
                                       jnp.float32) * (2.0 / fan_in) ** 0.5
            gamma = 0.5 + jax.random.uniform(kg, (planes,), jnp.float32)
            beta = 0.1 * jax.random.normal(kb, (planes,), jnp.float32)
            mean = 0.1 * jax.random.normal(km, (planes,), jnp.float32)
            var = 0.5 + jax.random.uniform(kv, (planes,), jnp.float32)
            scale = gamma / jnp.sqrt(var + eps)
            bias = beta - mean * scale
            # (Cout, Cin, 3, 3) -> (Cout, 9*Cin), matching the in-kernel
            # im2col ordering col[(kh*KW + kw)*Cin + ci, :].
            wmat = jnp.transpose(w_oihw, (0, 2, 3, 1)).reshape(planes, -1)
            return dict(w_oihw=w_oihw,                     # f32, for reference
                        wmat=wmat.astype(jnp.bfloat16),    # bf16 MXU operand
                        scale=scale.reshape(planes, 1),
                        bias=bias.reshape(planes, 1))

        self.k2 = make_branch(*keys[0:5])
        self.k3 = make_branch(*keys[5:10])
        self.k4 = make_branch(*keys[10:15])

    def __call__(self, x_nchw, xe_nchw):
        N, C, H, W = x_nchw.shape
        _, _, He, We = xe_nchw.shape
        p, d = self.padding, self.dilation

        # NCHW -> NC(H*W): free reshapes (channels on sublanes, H*W on lanes).
        x = x_nchw.reshape(N, C, H * W)
        xe = xe_nchw.reshape(N, C, He * We)

        # Stage 1: k2 conv + norm on x_e (bf16 output).
        k2o = _conv_call(_conv_bn_kernel, [xe], self.k2["wmat"],
                         self.k2["scale"], self.k2["bias"],
                         H=He, W=We, p=p, d=d, out_dtype=jnp.bfloat16)
        # Nearest resize to the identity spatial size (no-op when shapes match).
        # TODO(synk): fuse the size-changing gather into the stage-2 kernel.
        if (He, We) != (H, W):
            hi = (jnp.arange(H) * He // H).astype(jnp.int32)
            wi = (jnp.arange(W) * We // W).astype(jnp.int32)
            k2o = k2o.reshape(N, C, He, We)[:, :, hi][:, :, :, wi]
            k2o = k2o.reshape(N, C, H * W)

        # Stage 2 (fused): out = sigmoid(x + k2o); temp = k3(out); out = temp*out.
        prod = _conv_call(_fused_mid_kernel, [x, k2o], self.k3["wmat"],
                          self.k3["scale"], self.k3["bias"],
                          H=H, W=W, p=p, d=d, out_dtype=jnp.bfloat16)

        # Stage 3: k4 conv + norm.  Strided case = 'same' stride-1 conv
        # subsampled at the end (stride == 1 in EIANet usage).
        y = _conv_call(_conv_bn_kernel, [prod], self.k4["wmat"],
                       self.k4["scale"], self.k4["bias"],
                       H=H, W=W, p=p, d=d, out_dtype=jnp.float32)
        y = y.reshape(N, C, H, W)
        if self.stride > 1:
            y = y[:, :, ::self.stride, ::self.stride]
        return y


# ----------------------------------------------------------------------------
# Pure-JAX reference (bf16-rounded weights, f32 math) for a sanity check.
# ----------------------------------------------------------------------------
def _reference_forward(module, x, x_e):
    p, d, s = module.padding, module.dilation, module.stride

    def conv_bn(v, br, stride):
        w = br["w_oihw"].astype(jnp.bfloat16).astype(jnp.float32)
        y = lax.conv_general_dilated(
            v, w, window_strides=(stride, stride),
            padding=((p, p), (p, p)), rhs_dilation=(d, d),
            dimension_numbers=("NCHW", "OIHW", "NCHW"))
        return (y * br["scale"].reshape(1, -1, 1, 1)
                + br["bias"].reshape(1, -1, 1, 1))

    H, W = x.shape[2:]
    k2o = conv_bn(x_e, module.k2, 1)
    He, We = k2o.shape[2:]
    if (He, We) != (H, W):
        hi = jnp.arange(H) * He // H
        wi = jnp.arange(W) * We // W
        k2o = k2o[:, :, hi][:, :, :, wi]
    out = jax.nn.sigmoid(x + k2o)
    temp = conv_bn(out, module.k3, 1)
    out = temp * out
    return conv_bn(out, module.k4, s)


# ----------------------------------------------------------------------------
if __name__ == "__main__":
    key = jax.random.PRNGKey(0)
    k_params, k_x, k_xe = jax.random.split(key, 3)

    N, C, H, W = 2, 8, 16, 16
    module = Conv3ePallas(inplanes=C, planes=C, stride=1, padding=1,
                          dilation=1, groups=1, pooling_r=4, key=k_params)

    x = jax.random.normal(k_x, (N, C, H, W), jnp.float32)
    x_e = jax.random.normal(k_xe, (N, C, H, W), jnp.float32)

    out = module(x, x_e)
    jax.block_until_ready(out)
    assert out.shape == (N, C, H, W), out.shape

    ref = _reference_forward(module, x, x_e)
    max_err = float(jnp.max(jnp.abs(out - ref)))
    assert max_err < 0.3, f"max abs err vs reference: {max_err}"

    print("KERNEL_OK")
</pallas_src>

<mosaic_0001>
module attributes {stable_mosaic.version = 11 : i64} {
  func.func @_conv_bn_kernel(%arg0: i32, %arg1: memref<1x8x256xf32, #tpu.memory_space<vmem>>, %arg2: memref<8x72xbf16, #tpu.memory_space<vmem>>, %arg3: memref<8x1xf32, #tpu.memory_space<vmem>>, %arg4: memref<8x1xf32, #tpu.memory_space<vmem>>, %arg5: memref<3x256xf32, #tpu.memory_space<vmem>>, %arg6: memref<1x8x256xbf16, #tpu.memory_space<vmem>>, %arg7: memref<8x401xf32, #tpu.memory_space<vmem>>, %arg8: memref<72x256xbf16, #tpu.memory_space<vmem>>) attributes {dimension_semantics = [#tpu.dimension_semantics<parallel>], iteration_bounds = array<i64: 2>, scalar_prefetch = 0 : i64, scratch_operands = 2 : i64, tpu.core_type = #tpu.core_type<tc>, window_params = [{transform_indices = @transform_0, window_bounds = array<i64: 1, 8, 256>}, {pipeline_mode = #tpu.pipeline_mode<synchronous>, transform_indices = @transform_1, window_bounds = array<i64: 8, 72>}, {pipeline_mode = #tpu.pipeline_mode<synchronous>, transform_indices = @transform_2, window_bounds = array<i64: 8, 1>}, {pipeline_mode = #tpu.pipeline_mode<synchronous>, transform_indices = @transform_3, window_bounds = array<i64: 8, 1>}, {pipeline_mode = #tpu.pipeline_mode<synchronous>, transform_indices = @transform_4, window_bounds = array<i64: 3, 256>}, {transform_indices = @transform_5, window_bounds = array<i64: 1, 8, 256>}]} {
    %c0 = arith.constant 0 : index
    %c0_0 = arith.constant 0 : index
    %c0_1 = arith.constant 0 : index
    %0 = vector.load %arg1[%c0, %c0_0, %c0_1] : memref<1x8x256xf32, #tpu.memory_space<vmem>>, vector<1x8x256xf32>
    %1 = vector.shape_cast %0 : vector<1x8x256xf32> to vector<8x256xf32>
    %cst = arith.constant 0.000000e+00 : f32
    %2 = vector.broadcast %cst : f32 to vector<8x401xf32>
    %c0_2 = arith.constant 0 : index
    %c0_3 = arith.constant 0 : index
    %3 = vector.load %arg7[%c0_2, %c0_3] : memref<8x401xf32, #tpu.memory_space<vmem>>, vector<8x401xf32>
    tpu.vector_store %arg7[%c0_2, %c0_3], %2 {strides = array<i32>} : memref<8x401xf32, #tpu.memory_space<vmem>>, vector<8x401xf32>,
    %c0_4 = arith.constant 0 : index
    %c128 = arith.constant 128 : index
    %4 = vector.load %arg7[%c0_4, %c128] : memref<8x401xf32, #tpu.memory_space<vmem>>, vector<8x256xf32>
    tpu.vector_store %arg7[%c0_4, %c128], %1 {strides = array<i32>} : memref<8x401xf32, #tpu.memory_space<vmem>>, vector<8x256xf32>,
    %c0_5 = arith.constant 0 : index
    %c111 = arith.constant 111 : index
    %5 = vector.load %arg7[%c0_5, %c111] : memref<8x401xf32, #tpu.memory_space<vmem>>, vector<8x256xf32>
    %c0_6 = arith.constant 0 : index
    %c0_7 = arith.constant 0 : index
    %6 = vector.load %arg5[%c0_6, %c0_7] : memref<3x256xf32, #tpu.memory_space<vmem>>, vector<1x256xf32>
    %7 = vector.broadcast %6 : vector<1x256xf32> to vector<8x256xf32>
    %8 = arith.mulf %5, %7 : vector<8x256xf32>
    %9 = arith.truncf %8 : vector<8x256xf32> to vector<8x256xbf16>
    %c0_8 = arith.constant 0 : index
    %c0_9 = arith.constant 0 : index
    %10 = vector.load %arg8[%c0_8, %c0_9] : memref<72x256xbf16, #tpu.memory_space<vmem>>, vector<8x256xbf16>
    tpu.vector_store %arg8[%c0_8, %c0_9], %9 {strides = array<i32>} : memref<72x256xbf16, #tpu.memory_space<vmem>>, vector<8x256xbf16>,
    %c0_10 = arith.constant 0 : index
    %c112 = arith.constant 112 : index
    %11 = vector.load %arg7[%c0_10, %c112] : memref<8x401xf32, #tpu.memory_space<vmem>>, vector<8x256xf32>
    %12 = arith.truncf %11 : vector<8x256xf32> to vector<8x256xbf16>
    %c8 = arith.constant 8 : index
    %c0_11 = arith.constant 0 : index
    %13 = vector.load %arg8[%c8, %c0_11] : memref<72x256xbf16, #tpu.memory_space<vmem>>, vector<8x256xbf16>
    tpu.vector_store %arg8[%c8, %c0_11], %12 {strides = array<i32>} : memref<72x256xbf16, #tpu.memory_space<vmem>>, vector<8x256xbf16>,
    %c0_12 = arith.constant 0 : index
    %c113 = arith.constant 113 : index
    %14 = vector.load %arg7[%c0_12, %c113] : memref<8x401xf32, #tpu.memory_space<vmem>>, vector<8x256xf32>
    %c2 = arith.constant 2 : index
    %c0_13 = arith.constant 0 : index
    %15 = vector.load %arg5[%c2, %c0_13] : memref<3x256xf32, #tpu.memory_space<vmem>>, vector<1x256xf32>
    %16 = vector.broadcast %15 : vector<1x256xf32> to vector<8x256xf32>
    %17 = arith.mulf %14, %16 : vector<8x256xf32>
    %18 = arith.truncf %17 : vector<8x256xf32> to vector<8x256xbf16>
    %c16 = arith.constant 16 : index
    %c0_14 = arith.constant 0 : index
    %19 = vector.load %arg8[%c16, %c0_14] : memref<72x256xbf16, #tpu.memory_space<vmem>>, vector<8x256xbf16>
    tpu.vector_store %arg8[%c16, %c0_14], %18 {strides = array<i32>} : memref<72x256xbf16, #tpu.memory_space<vmem>>, vector<8x256xbf16>,
    %c0_15 = arith.constant 0 : index
    %c127 = arith.constant 127 : index
    %20 = vector.load %arg7[%c0_15, %c127] : memref<8x401xf32, #tpu.memory_space<vmem>>, vector<8x256xf32>
    %c0_16 = arith.constant 0 : index
    %c0_17 = arith.constant 0 : index
    %21 = vector.load %arg5[%c0_16, %c0_17] : memref<3x256xf32, #tpu.memory_space<vmem>>, vector<1x256xf32>
    %22 = vector.broadcast %21 : vector<1x256xf32> to vector<8x256xf32>
    %23 = arith.mulf %20, %22 : vector<8x256xf32>
    %24 = arith.truncf %23 : vector<8x256xf32> to vector<8x256xbf16>
    %c24 = arith.constant 24 : index
    %c0_18 = arith.constant 0 : index
    %25 = vector.load %arg8[%c24, %c0_18] : memref<72x256xbf16, #tpu.memory_space<vmem>>, vector<8x256xbf16>
    tpu.vector_store %arg8[%c24, %c0_18], %24 {strides = array<i32>} : memref<72x256xbf16, #tpu.memory_space<vmem>>, vector<8x256xbf16>,
    %c0_19 = arith.constant 0 : index
    %c128_20 = arith.constant 128 : index
    %26 = vector.load %arg7[%c0_19, %c128_20] : memref<8x401xf32, #tpu.memory_space<vmem>>, vector<8x256xf32>
    %27 = arith.truncf %26 : vector<8x256xf32> to vector<8x256xbf16>
    %c32 = arith.constant 32 : index
    %c0_21 = arith.constant 0 : index
    %28 = vector.load %arg8[%c32, %c0_21] : memref<72x256xbf16, #tpu.memory_space<vmem>>, vector<8x256xbf16>
    tpu.vector_store %arg8[%c32, %c0_21], %27 {strides = array<i32>} : memref<72x256xbf16, #tpu.memory_space<vmem>>, vector<8x256xbf16>,
    %c0_22 = arith.constant 0 : index
    %c129 = arith.constant 129 : index
    %29 = vector.load %arg7[%c0_22, %c129] : memref<8x401xf32, #tpu.memory_space<vmem>>, vector<8x256xf32>
    %c2_23 = arith.constant 2 : index
    %c0_24 = arith.constant 0 : index
    %30 = vector.load %arg5[%c2_23, %c0_24] : memref<3x256xf32, #tpu.memory_space<vmem>>, vector<1x256xf32>
    %31 = vector.broadcast %30 : vector<1x256xf32> to vector<8x256xf32>
    %32 = arith.mulf %29, %31 : vector<8x256xf32>
    %33 = arith.truncf %32 : vector<8x256xf32> to vector<8x256xbf16>
    %c40 = arith.constant 40 : index
    %c0_25 = arith.constant 0 : index
    %34 = vector.load %arg8[%c40, %c0_25] : memref<72x256xbf16, #tpu.memory_space<vmem>>, vector<8x256xbf16>
    tpu.vector_store %arg8[%c40, %c0_25], %33 {strides = array<i32>} : memref<72x256xbf16, #tpu.memory_space<vmem>>, vector<8x256xbf16>,
    %c0_26 = arith.constant 0 : index
    %c143 = arith.constant 143 : index
    %35 = vector.load %arg7[%c0_26, %c143] : memref<8x401xf32, #tpu.memory_space<vmem>>, vector<8x256xf32>
    %c0_27 = arith.constant 0 : index
    %c0_28 = arith.constant 0 : index
    %36 = vector.load %arg5[%c0_27, %c0_28] : memref<3x256xf32, #tpu.memory_space<vmem>>, vector<1x256xf32>
    %37 = vector.broadcast %36 : vector<1x256xf32> to vector<8x256xf32>
    %38 = arith.mulf %35, %37 : vector<8x256xf32>
    %39 = arith.truncf %38 : vector<8x256xf32> to vector<8x256xbf16>
    %c48 = arith.constant 48 : index
    %c0_29 = arith.constant 0 : index
    %40 = vector.load %arg8[%c48, %c0_29] : memref<72x256xbf16, #tpu.memory_space<vmem>>, vector<8x256xbf16>
    tpu.vector_store %arg8[%c48, %c0_29], %39 {strides = array<i32>} : memref<72x256xbf16, #tpu.memory_space<vmem>>, vector<8x256xbf16>,
    %c0_30 = arith.constant 0 : index
    %c144 = arith.constant 144 : index
    %41 = vector.load %arg7[%c0_30, %c144] : memref<8x401xf32, #tpu.memory_space<vmem>>, vector<8x256xf32>
    %42 = arith.truncf %41 : vector<8x256xf32> to vector<8x256xbf16>
    %c56 = arith.constant 56 : index
    %c0_31 = arith.constant 0 : index
    %43 = vector.load %arg8[%c56, %c0_31] : memref<72x256xbf16, #tpu.memory_space<vmem>>, vector<8x256xbf16>
    tpu.vector_store %arg8[%c56, %c0_31], %42 {strides = array<i32>} : memref<72x256xbf16, #tpu.memory_space<vmem>>, vector<8x256xbf16>,
    %c0_32 = arith.constant 0 : index
    %c145 = arith.constant 145 : index
    %44 = vector.load %arg7[%c0_32, %c145] : memref<8x401xf32, #tpu.memory_space<vmem>>, vector<8x256xf32>
    %c2_33 = arith.constant 2 : index
    %c0_34 = arith.constant 0 : index
    %45 = vector.load %arg5[%c2_33, %c0_34] : memref<3x256xf32, #tpu.memory_space<vmem>>, vector<1x256xf32>
    %46 = vector.broadcast %45 : vector<1x256xf32> to vector<8x256xf32>
    %47 = arith.mulf %44, %46 : vector<8x256xf32>
    %48 = arith.truncf %47 : vector<8x256xf32> to vector<8x256xbf16>
    %c64 = arith.constant 64 : index
    %c0_35 = arith.constant 0 : index
    %49 = vector.load %arg8[%c64, %c0_35] : memref<72x256xbf16, #tpu.memory_space<vmem>>, vector<8x256xbf16>
    tpu.vector_store %arg8[%c64, %c0_35], %48 {strides = array<i32>} : memref<72x256xbf16, #tpu.memory_space<vmem>>, vector<8x256xbf16>,
    %c0_36 = arith.constant 0 : index
    %c0_37 = arith.constant 0 : index
    %50 = vector.load %arg2[%c0_36, %c0_37] : memref<8x72xbf16, #tpu.memory_space<vmem>>, vector<8x72xbf16>
    %c0_38 = arith.constant 0 : index
    %c0_39 = arith.constant 0 : index
    %51 = vector.load %arg8[%c0_38, %c0_39] : memref<72x256xbf16, #tpu.memory_space<vmem>>, vector<72x256xbf16>
    %cst_40 = arith.constant dense<0.000000e+00> : vector<8x256xf32>
    %52 = tpu.matmul %50, %51, %cst_40 {dimension_numbers = #tpu.dot_dimension_numbers<[1], [0], [0], [1], [0, 0, 1, 1], [], []>} : vector<8x72xbf16>, vector<72x256xbf16>, vector<8x256xf32> -> vector<8x256xf32>
    %c0_41 = arith.constant 0 : index
    %c0_42 = arith.constant 0 : index
    %53 = vector.load %arg3[%c0_41, %c0_42] : memref<8x1xf32, #tpu.memory_space<vmem>>, vector<8x1xf32>
    %54 = vector.broadcast %53 : vector<8x1xf32> to vector<8x256xf32>
    %55 = arith.mulf %52, %54 : vector<8x256xf32>
    %c0_43 = arith.constant 0 : index
    %c0_44 = arith.constant 0 : index
    %56 = vector.load %arg4[%c0_43, %c0_44] : memref<8x1xf32, #tpu.memory_space<vmem>>, vector<8x1xf32>
    %57 = vector.broadcast %56 : vector<8x1xf32> to vector<8x256xf32>
    %58 = arith.addf %55, %57 : vector<8x256xf32>
    %59 = arith.truncf %58 : vector<8x256xf32> to vector<8x256xbf16>
    %c0_45 = arith.constant 0 : index
    %c0_46 = arith.constant 0 : index
    %c0_47 = arith.constant 0 : index
    %60 = vector.load %arg6[%c0_45, %c0_46, %c0_47] : memref<1x8x256xbf16, #tpu.memory_space<vmem>>, vector<1x8x256xbf16>
    %61 = vector.shape_cast %60 : vector<1x8x256xbf16> to vector<8x256xbf16>
    %62 = vector.shape_cast %59 : vector<8x256xbf16> to vector<1x8x256xbf16>
    tpu.vector_store %arg6[%c0_45, %c0_46, %c0_47], %62 {strides = array<i32>} : memref<1x8x256xbf16, #tpu.memory_space<vmem>>, vector<1x8x256xbf16>,
    return
  }
  func.func @transform_0(%arg0: i32) -> (i32, i32, i32) {
    %c0_i32 = arith.constant 0 : i32
    %c0_i32_0 = arith.constant 0 : i32
    %c0_i32_1 = arith.constant 0 : i32
    return %arg0, %c0_i32, %c0_i32_0 : i32, i32, i32
  }
  func.func @transform_1(%arg0: i32) -> (i32, i32) {
    %c0_i32 = arith.constant 0 : i32
    %c0_i32_0 = arith.constant 0 : i32
    %c0_i32_1 = arith.constant 0 : i32
    return %c0_i32, %c0_i32_0 : i32, i32
  }
  func.func @transform_2(%arg0: i32) -> (i32, i32) {
    %c0_i32 = arith.constant 0 : i32
    %c0_i32_0 = arith.constant 0 : i32
    %c0_i32_1 = arith.constant 0 : i32
    return %c0_i32, %c0_i32_0 : i32, i32
  }
  func.func @transform_3(%arg0: i32) -> (i32, i32) {
    %c0_i32 = arith.constant 0 : i32
    %c0_i32_0 = arith.constant 0 : i32
    %c0_i32_1 = arith.constant 0 : i32
    return %c0_i32, %c0_i32_0 : i32, i32
  }
  func.func @transform_4(%arg0: i32) -> (i32, i32) {
    %c0_i32 = arith.constant 0 : i32
    %c0_i32_0 = arith.constant 0 : i32
    %c0_i32_1 = arith.constant 0 : i32
    return %c0_i32, %c0_i32_0 : i32, i32
  }
  func.func @transform_5(%arg0: i32) -> (i32, i32, i32) {
    %c0_i32 = arith.constant 0 : i32
    %c0_i32_0 = arith.constant 0 : i32
    %c0_i32_1 = arith.constant 0 : i32
    return %arg0, %c0_i32, %c0_i32_0 : i32, i32, i32
  }
}

</mosaic_0001>

<bundles_post_ra>
// kernel: tpu_custom_call.1
= control target key start
LH: loop header
LB: loop body
LE: loop exit
PB: predicated region body
PF: predicated region fallthrough
CT: control target
= control target key end

     0   :  { %10 = vsyncpa [#allocation5], 0  ;;  %s1182_s0 = inlined_call_operand.hbm [shape: f32[2,8,256], index: 0, kind: input, shape index: {}]   ;;  %s1183_s1 = inlined_call_operand.vmem [shape: bf16[8,72], index: 1, kind: input, shape index: {}]   ;;  %s1184_s2 = inlined_call_operand.vmem [shape: f32[8,1], index: 2, kind: input, shape index: {}]   ;;  %s1185_s3 = inlined_call_operand.vmem [shape: f32[8,1], index: 3, kind: input, shape index: {}]   ;;  %s1186_s4 = inlined_call_operand.vmem [shape: f32[3,256], index: 4, kind: input, shape index: {}]   ;;  %s1187_s5 = inlined_call_operand.hbm [shape: bf16[2,8,256], index: 5, kind: output, shape index: {}]  }
   0x1   :  { %12 = vsyncpa [#allocation5 + $0x1], 0 }
   0x2   :  { %13 = vsyncpa [#allocation6], 0 }
   0x3   :  { %15 = vsyncpa [#allocation6 + $0x1], 0  ;;  %s953_s18 = smov 0   ;;  %s955_s19 = smov 0  }
   0x4   :  { %s957_s20 = smov 0   ;;  %s959_s21 = smov 0  }
   0x5 LB: > { %s974_s22 = sadd.s32 4294967295, %s911_s21   ;;  %s695_s23 = sadd.s32 4294967294, %s911_s21   ;;  %s911_s21 = sphi %s959_s21, %s1197_s21   ;;  %s907_s20 = sphi %s957_s20, %s1196_s20   ;;  %s903_s19 = sphi %s955_s19, %s1195_s19   ;;  %s899_s18 = sphi %s953_s18, %s1194_s18  }
   0x6   : > { %s978_s24 = sadd.s32 1, %s911_s21   ;;  %s28_s25 = sadd.s32 1, %s907_s20 }
   0x7   : > { %s25_s26 = ssub.s32 %s911_s21, %s978_s24  ;;  %p35_p0 = scmp.ne.s32.totalorder %s907_s20, %s903_s19 }
   0x8   : > { %p26_p1 = scmp.eq.s32.totalorder %s25_s26, 0  ;;  %p36_p2 = scmp.eq.s32.totalorder %s911_s21, 0 }
   0x9   : > { %p41_p3 = scmp.ne.s32.totalorder %s903_s19, %s899_s18  ;;  %p42_p4 = scmp.eq.s32.totalorder %s974_s22, 0 }
   0xa   : > { %s990_s27 = scalar_select %p26_p1, %s907_s20, %s28_s25  }
   0xb   : > { %p992_p5 = por %p36_p2, %p35_p0  ;;  %p996_p6 = por %p42_p4, %p41_p3 }
   0xc   : > { %p149_p7 = scmp.eq.s32.totalorder %s974_s22, 1  ;;  %p155_p8 = scmp.eq.s32.totalorder %s695_s23, 1 }
   0xd   : > { %p768_p10 = scmp.lt.s32.totalorder %s911_s21, 2  ;;  %s187_s7 = sand.u32 1, %s907_s20  }
   0xe   : > { %p1003_p11 = por %p149_p7, %p35_p0  ;;  %p1007_p12 = por %p155_p8, %p41_p3 }
   0xf   : > { %s746_s8 = sshll.u32 %s911_s21, 4  ;;  %s698_s9 = sshll.u32 %s187_s7, 4 }
  0x10   : > { %s196_s12 = scalar_lea.hbm %s1182_s0, %s746_s8  ;;  %s191_s14 = scalar_lea.vmem [#allocation4], %s698_s9 }
  0x11   : > { %s198_s13 = sshll.u32 %s196_s12, 4  ;;  %s200_s15 = sshll.u32 %s191_s14, 4  ;;  %s199_s13 = int_to_ptr.hbm [resolvable:$true] %s198_s13  ;;  %s201_s15 = int_to_ptr.vmem [resolvable:$true] %s200_s15 }
  0x12   : > { %p1018_p13 = pnand %p768_p10, %p992_p5  ;;  %p701_p0 = scmp.ge.s32.totalorder %s911_s21, 1 }
  0x13   : > { %p205_p1 = scmp.lt.s32.totalorder %s911_s21, 3  ;;  %s188_s17 = scalar_lea.sflag [#allocation5], %s187_s7 }
  0x14   : > { %s815_s23 = sshra.s32 %s199_s13, 4  ;;  %p819_p3 = pneg %p1018_p13  ;;  %s816_s23 = int_to_ptr.hbm [resolvable:$true] %s815_s23 }
  0x15   : > { %s817_s25 = scalar_lea.hbm %s816_s23, 16  ;;  %s822_s28 = scalar_lea.hbm %s1182_s0, 32 }
  0x16   : > { %p818_p2 = scmp.ne.s32.totalorder %s816_s23, %s817_s25  ;;  %p823_p5 = scmp.lt.s32.totalorder %s816_s23, %s1182_s0 }
  0x17   : > { %p824_p8 = scmp.lt.s32.totalorder %s822_s28, %s817_s25 }
  0x18   : > { %p820_p4 = pnand %p819_p3, %p818_p2 }
  0x19   : > { %p825_p10 = por %p824_p8, %p823_p5 }
  0x1a   : > { %p821_p7 = pneg %p820_p4 }
  0x1c   : > { %p826_p9 = pnand %p825_p10, %p821_p7 }
  0x1e   : > { %829 = shalt.err (!%p826_p9)
}
  0x1f   : > { %763 = dma.hbm_to_vmem [thread:$0]  (!%p1018_p13), %s199_s13, 256, %s201_s15, %s188_s17  }
  0x20   : > { %p206_p2 = pnand %p701_p0, %p205_p1 }
  0x21   : > { %s1039_s7 = sand.u32 (!%p206_p2), 1, %s903_s19  }
  0x22   : > { %209 = sbr.rel (%p206_p2) target bundleno = 479 (0x1df), region = 40  ;;  %s702_s11 = sshll.u32 (!%p206_p2), %s1039_s7, 4 }
  0x23   : > { %s212_s12 = scalar_lea.sflag (!%p206_p2), [#allocation5], %s1039_s7  ;;  %s1043_s14 = scalar_lea.vmem (!%p206_p2), [#allocation4], %s702_s11 }
  0x27   : > { %890 = dma.done.wait (%p996_p6), %s212_s12, 256  }
  0x28   : > { %892 = vsyncadd (%p996_p6), %s212_s12, 4294967040  ;;  %v706_v0 = vld [vmem:[%s1186_s4 + $0x2] ss:$4 sm:$0x3]  ;;  %s913_s23 = smov 17   ;;  %s914_s25 = smov 15  }
  0x29   : > { %v416_v1 = vld [vmem:[%s1186_s4] ss:$4 sm:$0x3]  ;;  %v470_v2 = vperm.slane %v706_v0, 0  ;;  %s915_s29 = smov 1   ;;  %v471_v6 = vperm.slane %v706_v0, 1 }
  0x2a   : > { %v418_v3 = vperm.slane %v416_v1, 0  ;;  %v705_v4 = vld [vmem:[%s1186_s4 + $0x2] ss:$4 sm:$0x3]  ;;  %v419_v7 = vperm.slane %v416_v1, 1  ;;  %s916_s12 = smov 113  }
  0x2b   : > { %472 = vrot.lane.b32.xlu0 %v470_v2, %s913_s23  ;;  %v384_v5 = vperm.slane %v705_v4, 0  ;;  %v385_v8 = vperm.slane %v705_v4, 1  ;;  %v704_v9 = vld [vmem:[%s1186_s4 + $0x2] ss:$4 sm:$0x3]  ;;  %s917_s16 = smov 127  }
  0x2c   : > { %420 = vrot.lane.b32.xlu1 %v418_v3, %s914_s25  ;;  %v313_v10 = vperm.slane %v704_v9, 1  ;;  %v312_v11 = vperm.slane %v704_v9, 0  ;;  %v344_v12 = vld [vmem:[%s1186_s4] ss:$4 sm:$0x3]  ;;  %s918_s17 = smov 111  }
  0x2d   : > { %386 = vrot.lane.b32.xlu2 %v384_v5, %s915_s29  ;;  %v346_v13 = vperm.slane %v344_v12, 0  ;;  %v256_v14 = vld [vmem:[%s1186_s4] ss:$4 sm:$0x3]  ;;  %v347_v15 = vperm.slane %v344_v12, 1  ;;  %v1080_v18 = vld [vmem:[%s1043_s14] sm:$0xff] }
  0x2e   : > { %v258_v16 = vperm.slane %v256_v14, 0  ;;  %v259_v17 = vperm.slane %v256_v14, 1  ;;  %vm249_vm0 = vcmask 138240   ;;  %v1083_v19 = vld [vmem:[%s1043_s14 + $0x8] sm:$0xff]  ;;  %v919_v21 = vmov 0.0   ;;  %s920_s26 = smov 112  }
  0x2f   : > { %v450_v20 = vpack.c.bf16 %v1083_v19, %v1080_v18  ;;  %250 = vst.msk [vmem:[#allocation2 + $0x18] sm:$0xff] %vm249_vm0, %v919_v21  ;;  %vm352_vm1 = vcmask 1039360   ;;  %vm337_vm2 = vcmask 121856   ;;  %vm371_vm3 = vcmask 7168   ;;  %s921_s14 = smov 16   ;;  %s703_s10 = sshll.u32 %s1039_s7, 3 }
  0x30   : > { %vm264_vm4 = vcmask 908288   ;;  %vm318_vm5 = vcmask 924672   ;;  %v291_v9 = vpack.c.bf16 %v1080_v18, %v919_v21  ;;  %vm282_vm6 = vcmask 1043456   ;;  %s755_s11 = sshll.u32 %s974_s22, 3  ;;  %s609_s22 = scalar_lea.sflag [#allocation6], %s1039_s7 }
  0x31   : > { %378 = vst [vmem:[#allocation3 + $0x20] sm:$0xff] %v450_v20  ;;  %vm461_vm7 = vcmask 916480   ;;  %vm302_vm8 = vcmask 130048   ;;  %vm553_vm9 = vcmask 588800   ;;  %s620_s15 = scalar_lea.hbm %s1187_s5, %s755_s11 }
  0x33   : > { %474 = vrot.lane.b32.xlu0 %v471_v6, %s913_s23 }
  0x34   : > { %422 = vrot.lane.b32.xlu1 %v419_v7, %s914_s25 }
  0x35   : > { %388 = vrot.lane.b32.xlu2 %v385_v8, %s915_s29  ;;  %v292_v8 = vpack.c.bf16 %v1083_v19, %v1083_v19 }
  0x36   : > { %v467_v22 = vld [vmem:[#allocation2 + $0x18] sm:$0xff] }
  0x37   : > { %v451_v23 = vpack.c.bf16 %v467_v22, %v467_v22 }
  0x3b   : > { %314 = vrot.lane.b32.xlu0 %v312_v11, %s916_s12 }
  0x3c   : > { %316 = vrot.lane.b32.xlu1 %v313_v10, %s916_s12 }
  0x3d   : > { %348 = vrot.lane.b32.xlu2 %v346_v13, %s917_s16 }
  0x43   : > { %350 = vrot.lane.b32.xlu0 %v347_v15, %s917_s16 }
  0x44   : > { %260 = vrot.lane.b32.xlu1 %v258_v16, %s918_s17 }
  0x45   : > { %262 = vrot.lane.b32.xlu2 %v259_v17, %s918_s17 }
  0x4c   : > { %454 = vrot.lane.b32.xlu1 %v450_v20, %s920_s26 }
  0x4d   : > { %456 = vrot.lane.b32.xlu2 %v451_v23, %s920_s26  ;;  %s624_s26 = sshll.u32 %s620_s15, 4  ;;  %s625_s26 = int_to_ptr.hbm [resolvable:$true] %s624_s26 }
  0x87   : > { %v387_v26 = vpop.permute.xlu2 %386 }
  0x88   : > { %v395_v56 = vmul.f32 %v387_v26, %v1080_v18 }
  0x8f   : > { %v389_v33 = vpop.permute.xlu2 %388 }
  0x90   : > { %v397_v34 = vmul.f32 %v467_v22, %v389_v33  ;;  %v391_v53 = vsel %vm371_vm3, %v387_v26, %v389_v33 }
  0x91   : > { %v396_v58 = vmul.f32 %v391_v53, %v1083_v19 }
  0x92   : > { %v399_v37 = vpack.c.bf16 %v397_v34, %v397_v34 }
  0x93   : > { %v398_v0 = vpack.c.bf16 %v396_v58, %v395_v56 }
  0x97   : > { %v349_v40 = vpop.permute.xlu2 %348 }
  0x98   : > { %v357_v44 = vmul.f32 0.0, %v349_v40 }
  0x9d   : > { %v473_v24 = vpop.permute.xlu0 %472 }
  0x9e   : > { %v421_v25 = vpop.permute.xlu1 %420  ;;  %v480_v42 = vmul.f32 %v473_v24, %v1080_v18 }
  0x9f   : > { %v263_v51 = vpop.permute.xlu2 %262  ;;  %v429_v60 = vmul.f32 %v421_v25, %v1080_v18 }
  0xa0   : > { %v271_v55 = vmul.f32 %v263_v51, %v1083_v19 }
  0xa2   : > { %v273_v61 = vpack.c.bf16 %v271_v55, %v271_v55  ;;  %v598_v55 = vld [vmem:[%s1185_s3] sm:$0xff] }
  0xa5   : > { %v475_v27 = vpop.permute.xlu0 %474 }
  0xa6   : > { %v423_v28 = vpop.permute.xlu1 %422  ;;  %v482_v29 = vmul.f32 %v475_v27, %v467_v22  ;;  %v476_v41 = vsel %vm249_vm0, %v473_v24, %v475_v27 }
  0xa7   : > { %v431_v30 = vmul.f32 %v467_v22, %v423_v28  ;;  %v481_v43 = vmul.f32 %v476_v41, %v1083_v19  ;;  %v425_v52 = vsel %vm337_vm2, %v421_v25, %v423_v28  ;;  %v457_v10 = vpop.permute.xlu2 %456 }
  0xa8   : > { %v484_v31 = vpack.c.bf16 %v482_v29, %v482_v29  ;;  %v430_v57 = vmul.f32 %v425_v52, %v1083_v19  ;;  %v459_v11 = vrot.slane %v457_v10, 4 }
  0xa9   : > { %v433_v32 = vpack.c.bf16 %v431_v30, %v431_v30  ;;  %v483_v50 = vpack.c.bf16 %v481_v43, %v480_v42 }
  0xaa   : > { %489 = vrot.lane.b32.xlu1 %v484_v31, %s918_s17  ;;  %v432_v63 = vpack.c.bf16 %v430_v57, %v429_v60  ;;  %v922_v57 = vmov 0  }
  0xab   : > { %438 = vrot.lane.b32.xlu0 %v433_v32, %s916_s12  ;;  %812 = vset.pattern.permute.xlu1 %v922_v57 }
  0xac   : > { %813 = vset.pattern.permute.xlu2 %v922_v57  ;;  %814 = vset.pattern.permute.xlu0 %v922_v57 }
  0xad   : > { %v315_v36 = vpop.permute.xlu0 %314 }
  0xae   : > { %v317_v35 = vpop.permute.xlu1 %316  ;;  %v323_v4 = vmul.f32 0.0, %v315_v36 }
  0xaf   : > { %v325_v38 = vmul.f32 %v317_v35, %v1083_v19  ;;  %v319_v1 = vsel %vm318_vm5, %v315_v36, %v317_v35 }
  0xb0   : > { %v324_v5 = vmul.f32 %v319_v1, %v1080_v18  ;;  %v725_v1 = vld [vmem:[#allocation3 + $0x20] sm:$0xf] }
  0xb1   : > { %v327_v39 = vpack.c.bf16 %v325_v38, %v325_v38 }
  0xb2   : > { %404 = vrot.lane.b32.xlu1 %v399_v37, %s917_s16  ;;  %v326_v7 = vpack.c.bf16 %v324_v5, %v323_v4 }
  0xb3   : > { %332 = vrot.lane.b32.xlu0 %v327_v39, %s914_s25 }
  0xb5   : > { %v351_v45 = vpop.permute.xlu0 %350 }
  0xb6   : > { %v353_v46 = vsel %vm352_vm1, %v349_v40, %v351_v45  ;;  %v359_v47 = vmul.f32 %v351_v45, %v1083_v19  ;;  %v261_v59 = vpop.permute.xlu1 %260 }
  0xb7   : > { %v358_v48 = vmul.f32 %v353_v46, %v1080_v18  ;;  %v265_v62 = vsel %vm264_vm4, %v261_v59, %v263_v51  ;;  %v269_v2 = vmul.f32 0.0, %v261_v59 }
  0xb8   : > { %v361_v49 = vpack.c.bf16 %v359_v47, %v359_v47  ;;  %v270_v3 = vmul.f32 %v265_v62, %v1080_v18 }
  0xb9   : > { %v360_v54 = vpack.c.bf16 %v358_v48, %v357_v44 }
  0xba   : > { %366 = vrot.lane.b32.xlu2 %v361_v49, %s915_s29  ;;  %v272_v6 = vpack.c.bf16 %v270_v3, %v269_v2  ;;  %v751_v2 = vld [vmem:[#allocation3 + $0x24] sm:$0xf] }
  0xbb   : > { %487 = vrot.lane.b32.xlu0 %v483_v50, %s918_s17  ;;  %364 = vrot.lane.b32.xlu1 %v360_v54, %s915_s29  ;;  %v590_v54 = vld [vmem:[%s1184_s2] sm:$0xff]  ;;  %s865_s29 = scalar_lea.hbm %s1187_s5, 16 }
  0xbe   : > { %v455_v12 = vpop.permute.xlu1 %454 }
  0xbf   : > { %v458_v13 = vrot.slane %v455_v12, 4 }
  0xc1   : > { %v460_v14 = vsel %vm282_vm6, %v458_v13, %v459_v11 }
  0xc2   : > { %436 = vrot.lane.b32.xlu2 %v432_v63, %s916_s12  ;;  %v462_v15 = vsel %vm461_vm7, %v455_v12, %v460_v14 }
  0xc3   : > { %402 = vrot.lane.b32.xlu0 %v398_v0, %s917_s16  ;;  %278 = vrot.lane.b32.xlu1 %v273_v61, %s913_s23  ;;  %464 = vst [vmem:[#allocation3 + $0x38] sm:$0xff] %v462_v15  ;;  %s242_s16 = scalar_lea.vmem [#allocation7], %s703_s10 }
  0xc4   : > { %s622_s17 = sshll.u32 %s242_s16, 4  ;;  %s623_s17 = int_to_ptr.vmem [resolvable:$true] %s622_s17 }
  0xca   : > { %330 = vrot.lane.b32.xlu2 %v326_v7, %s914_s25  ;;  %v754_v47 = vld [vmem:[#allocation3 + $0x34] sm:$0xf0]  ;;  %v735_v48 = vld [vmem:[#allocation3 + $0x38] sm:$0xf0] }
  0xcb   : > { %276 = vrot.lane.b32.xlu0 %v272_v6, %s913_s23  ;;  %593 = vperm.xlu1 %812, %v590_v54  }
  0xd2   : > { %295 = vrot.lane.b32.xlu2 %v291_v9, %s921_s14 }
  0xd3   : > { %297 = vrot.lane.b32.xlu0 %v292_v8, %s921_s14  ;;  %s859_s14 = sshra.s32 %s625_s26, 4  ;;  %s860_s14 = int_to_ptr.hbm [resolvable:$true] %s859_s14 }
  0xd4   : > { %s861_s23 = scalar_lea.hbm %s860_s14, 8  ;;  %p866_p0 = scmp.lt.s32.totalorder %s860_s14, %s1187_s5 }
  0xd5   : > { %p862_p6 = scmp.ne.s32.totalorder %s860_s14, %s861_s23  ;;  %p867_p1 = scmp.lt.s32.totalorder %s865_s29, %s861_s23 }
  0xd7   : > { %p863_p9 = pnand %p862_p6, %p1003_p11  ;;  %p868_p3 = por %p867_p1, %p866_p0 }
  0xd9   : > { %p864_p13 = pneg %p863_p9 }
  0xda   : > { %601 = vperm.xlu2 %813, %v598_v55  }
  0xdb   : > { %p869_p4 = pnand %p868_p3, %p864_p13 }
 0x114   : > { %v367_v16 = vpop.permute.xlu2 %366 }
 0x115   : > { %v369_v35 = vrot.slane %v367_v16, 4 }
 0x11c   : > { %v437_v20 = vpop.permute.xlu2 %436  ;;  %v490_v23 = vpop.permute.xlu1 %489 }
 0x11d   : > { %v439_v17 = vpop.permute.xlu0 %438  ;;  %v440_v22 = vrot.slane %v437_v20, 4  ;;  %v492_v31 = vrot.slane %v490_v23, 4 }
 0x11e   : > { %v441_v19 = vrot.slane %v439_v17, 4 }
 0x120   : > { %v442_v18 = vsel %vm282_vm6, %v440_v22, %v441_v19 }
 0x121   : > { %v444_v21 = vsel %vm318_vm5, %v437_v20, %v442_v18 }
 0x122   : > { %446 = vst [vmem:[#allocation3 + $0x30] sm:$0xff] %v444_v21 }
 0x124   : > { %v331_v25 = vpop.permute.xlu2 %330  ;;  %v405_v28 = vpop.permute.xlu1 %404 }
 0x125   : > { %v333_v24 = vpop.permute.xlu0 %332  ;;  %v334_v27 = vrot.slane %v331_v25, 4  ;;  %v407_v49 = vrot.slane %v405_v28, 4 }
 0x126   : > { %v335_v26 = vrot.slane %v333_v24, 4 }
 0x128   : > { %v336_v29 = vsel %vm282_vm6, %v334_v27, %v335_v26  ;;  %v498_v27 = vld [vmem:[%s1183_s1] sm:$0xf] }
 0x129   : > { %v338_v30 = vsel %vm337_vm2, %v331_v25, %v336_v29  ;;  %v733_v46 = vld [vmem:[#allocation3 + $0x30] sm:$0xf]  ;;  %v753_v53 = vld [vmem:[#allocation3 + $0x34] sm:$0xf] }
 0x12a   : > { %340 = vst [vmem:[#allocation3 + $0x10] sm:$0xff] %v338_v30  ;;  %v734_v60 = vor.u32 %v754_v47, %v733_v46  ;;  %v738_v61 = vor.u32 %v753_v53, %v735_v48 }
 0x12c   : > { %v296_v5 = vpop.permute.xlu2 %295 }
 0x12d   : > { %v488_v32 = vpop.permute.xlu0 %487  ;;  %v365_v34 = vpop.permute.xlu1 %364  ;;  %v299_v12 = vrot.slane %v296_v5, 4 }
 0x12e   : > { %v491_v33 = vrot.slane %v488_v32, 4  ;;  %v368_v36 = vrot.slane %v365_v34, 4 }
 0x130   : > { %v493_v37 = vsel %vm282_vm6, %v491_v33, %v492_v31  ;;  %v370_v39 = vsel %vm282_vm6, %v368_v36, %v369_v35 }
 0x131   : > { %v495_v38 = vsel %vm264_vm4, %v488_v32, %v493_v37  ;;  %v372_v40 = vsel %vm371_vm3, %v365_v34, %v370_v39  ;;  %v717_v14 = vld [vmem:[#allocation3 + $0x10] sm:$0xf]  ;;  %v749_v15 = vld [vmem:[#allocation3 + $0x14] sm:$0xf] }
 0x132   : > { %v533_v41 = vunpack.c.l.b16 %v495_v38  ;;  %v534_v42 = vunpack.c.h.b16 %v495_v38  ;;  %374 = vst [vmem:[#allocation3 + $0x18] sm:$0xff] %v372_v40 }
 0x134   : > { %v543_v43 = vpack.c.b16 %v533_v41, %v533_v41  ;;  %v544_v44 = vpack.c.b16 %v534_v42, %v534_v42  ;;  %v602_v29 = vpop.permute.xlu2 %601 }
 0x135   : > { %v403_v45 = vpop.permute.xlu0 %402  ;;  %v279_v59 = vpop.permute.xlu1 %278 }
 0x136   : > { %v406_v50 = vrot.slane %v403_v45, 4  ;;  %v559_v51 = vsel %vm282_vm6, %v543_v43, 0  ;;  %v562_v52 = vsel %vm282_vm6, %v544_v44, 0  ;;  %v281_v62 = vrot.slane %v279_v59, 4 }
 0x137   : > { %567 = vmatpush.bf16.msra.mxu0 %v559_v51  ;;  %580 = vmatpush.bf16.msra.mxu1 %v562_v52 }
 0x138   : > { %v408_v56 = vsel %vm282_vm6, %v406_v50, %v407_v49 }
 0x139   : > { %v410_v58 = vsel %vm352_vm1, %v403_v45, %v408_v56  ;;  %v750_v10 = vld [vmem:[#allocation3 + $0x14] sm:$0xf0]  ;;  %v719_v11 = vld [vmem:[#allocation3 + $0x18] sm:$0xf0] }
 0x13a   : > { %412 = vst [vmem:[#allocation3 + $0x28] sm:$0xff] %v410_v58  ;;  %v718_v17 = vor.u32 %v750_v10, %v717_v14  ;;  %v722_v20 = vor.u32 %v749_v15, %v719_v11 }
 0x13b   : > { %568 = vmatpush.bf16.msra.mxu0 %v734_v60  ;;  %581 = vmatpush.bf16.msra.mxu1 %v738_v61 }
 0x13d   : > { %v277_v63 = vpop.permute.xlu0 %276  ;;  %v594_v28 = vpop.permute.xlu1 %593 }
 0x13e   : > { %v280_v0 = vrot.slane %v277_v63, 4 }
 0x140   : > { %v283_v3 = vsel %vm282_vm6, %v280_v0, %v281_v62 }
 0x141   : > { %v285_v4 = vsel %vm249_vm0, %v277_v63, %v283_v3  ;;  %v752_v6 = vld [vmem:[#allocation3 + $0x24] sm:$0xf0]  ;;  %v727_v7 = vld [vmem:[#allocation3 + $0x28] sm:$0xf0] }
 0x142   : > { %287 = vst [vmem:[#allocation3] sm:$0xff] %v285_v4  ;;  %v726_v8 = vor.u32 %v752_v6, %v725_v1  ;;  %v730_v9 = vor.u32 %v751_v2, %v727_v7 }
 0x144   : > { %569 = vmatpush.bf16.msra.mxu0 %v726_v8  ;;  %582 = vmatpush.bf16.msra.mxu1 %v730_v9 }
 0x145   : > { %v298_v13 = vpop.permute.xlu0 %297 }
 0x146   : > { %v300_v16 = vrot.slane %v298_v13, 4 }
 0x148   : > { %v301_v19 = vsel %vm282_vm6, %v299_v12, %v300_v16  ;;  %570 = vmatpush.bf16.msra.mxu0 %v718_v17  ;;  %583 = vmatpush.bf16.msra.mxu1 %v722_v20 }
 0x149   : > { %v303_v22 = vsel %vm302_vm8, %v296_v5, %v301_v19  ;;  %v709_v23 = vld [vmem:[#allocation3] sm:$0xf]  ;;  %v747_v21 = vld [vmem:[#allocation3 + $0x4] sm:$0xf] }
 0x14a   : > { %305 = vst [vmem:[#allocation3 + $0x8] sm:$0xff] %v303_v22 }
 0x151   : > { %v748_v18 = vld [vmem:[#allocation3 + $0x4] sm:$0xf0]  ;;  %v711_v24 = vld [vmem:[#allocation3 + $0x8] sm:$0xf0] }
 0x152   : > { %v710_v25 = vor.u32 %v748_v18, %v709_v23  ;;  %v714_v26 = vor.u32 %v747_v21, %v711_v24 }
 0x154   : > { %571 = vmatpush.bf16.msra.mxu0 %v710_v25  ;;  %584 = vmatpush.bf16.msra.mxu1 %v714_v26 }
 0x157   : > { %739 = vmatmul.msk.bf16.vlgmr.msra.gmra.mxu0 %vm553_vm9, %v498_v27  ;;  %740 = vmatmul.msk.bf16.vlgmr.msra.gmra.mxu1 %vm553_vm9, %v498_v27 }
 0x1d4   : > { %v573_v30 = vpop.f32.mrf.mxu0  ;;  %v586_v31 = vpop.f32.mrf.mxu1 }
 0x1d5   : > { %v596_v32 = vmul.f32 %v594_v28, %v573_v30  ;;  %v597_v33 = vmul.f32 %v594_v28, %v586_v31 }
 0x1d7   : > { %v604_v34 = vadd.f32 %v602_v29, %v596_v32  ;;  %v605_v35 = vadd.f32 %v602_v29, %v597_v33 }
 0x1d9   : > { %v606_v36 = vpack.c.bf16 %v605_v35, %v604_v34 }
 0x1db   : > { %607 = vst [vmem:[%s242_s16] sm:$0xff] %v606_v36 }
 0x1dc   : > { %v575_v37 = vpop.f32.mrf.mxu0  ;;  %v588_v38 = vpop.f32.mrf.mxu1 }
 0x1dd   : > { %872 = shalt.err (!%p869_p4)
}
 0x1de   : > { %758 = dma.vmem_to_hbm [thread:$0]  (%p1003_p11), %s623_s17, 128, %s625_s26, %s609_s22  }
 0x1df PF: > { %s636_s7 = sand.u32 1, %s899_s18   ;;  %p1193_p7 = scmp.ge.s32.totalorder %s911_s21, 2 }
 0x1e0   : > { %s637_s10 = scalar_lea.sflag [#allocation6], %s636_s7 }
 0x1e1   : > { %p765_p5 = pnand %p1193_p7, %p1007_p12 }
 0x1e3   : > { %p766_p8 = pneg %p765_p5 }
 0x1e5   : > { %894 = dma.done.wait (%p766_p8), %s637_s10, 128  }
 0x1e6   : > { %896 = vsyncadd (%p766_p8), %s637_s10, 4294967168  ;;  %p18_p10 = scmp.ge.s32.totalorder %s978_s24, 4   ;;  %s1194_s18 = smov %s903_s19 }
 0x1e7   : > { %s1195_s19 = smov %s907_s20  ;;  %s1196_s20 = smov %s990_s27 }
 0x1e8   : > { %s1197_s21 = smov %s978_s24  ;;  %20 = sbr.rel (!%p18_p10) target bundleno = 5 (0x5), region = 86 }
 0x1ed   :  { %643 = vsyncpa [#allocation5], 1 }
 0x1ee   :  { %645 = vsyncpa [#allocation5 + $0x1], 1 }
 0x1ef   :  { %646 = vsyncpa [#allocation6], 1 }
 0x1f0   :  { %648 = vsyncpa [#allocation6 + $0x1], 1 }

</bundles_post_ra>
